<compile_context>
chip_gen: v7x
topology: tpu7x:2x2x1
jax: 0.10.0
libtpu: 0.0.40
codegen_flags: <defaults>
</compile_context>

<pallas_src>
import functools

import jax
import jax.numpy as jnp
from jax.experimental import pallas as pl
from jax.experimental.pallas import tpu as pltpu


def _round_up(x: int, m: int) -> int:
    return ((x + m - 1) // m) * m


def _spectral_mix_kernel(x_ref, w_ref, o_ref):
    # x: [tm, Bp, 2Cip], w: [tm, 2Cip, 2Cop] (compute dtype, e.g. bf16)
    # o: [tm, Bp, 2Cop] -- one stacked real matmul per mode, f32 accumulation.
    # TODO(synk): if a bundle dump shows Mosaic relayout copies for the leading
    # mode batch dim, switch to an explicit lax.fori_loop of per-mode jnp.dot.
    o_ref[...] = jnp.einsum(
        'mbi,mio->mbo', x_ref[...], w_ref[...],
        preferred_element_type=jnp.float32).astype(o_ref.dtype)


def _tpu_vmem_and_cores():
    """Best-effort (VMEM bytes, TensorCores/chip) query with safe fallbacks."""
    vmem_cap = 64 << 20   # conservative default (v7x per-TC VMEM)
    cores = 1
    try:
        info = pltpu.get_tpu_info()
        cap = getattr(info, "vmem_capacity_bytes", None)
        if cap:
            vmem_cap = int(cap)
        for attr in ("num_cores", "tensor_cores_per_chip", "num_tensorcores"):
            v = getattr(info, attr, None)
            if v:
                cores = int(v)
                break
    except Exception:
        pass
    return vmem_cap, cores


def _choose_mode_tile(M, Bp, Ci2p, Co2p, in_itemsize, out_itemsize):
    """Mode-axis tile + vmem limit.

    Dims are already padded to layout multiples, so the raw-byte footprint is
    the real (padded) VMEM footprint.  Budget ~1/3 of physical VMEM for the
    double-buffered blocks; prefer the fewest, largest blocks on single-TC
    chips (v5e/v6e) and >= 2 blocks per core on multi-TC chips (v7x)."""
    vmem_cap, cores = _tpu_vmem_and_cores()
    budget = max(vmem_cap // 3, 8 << 20)
    per_mode = 2 * (in_itemsize * (Bp * Ci2p + Ci2p * Co2p)
                    + out_itemsize * Bp * Co2p)          # x2: double buffering
    tm = max(1, min(M, budget // max(per_mode, 1)))
    if cores > 1 and M >= 2 * cores:
        tm = min(tm, pl.cdiv(M, 2 * cores))              # keep both TCs fed
    vmem_limit = int(min(vmem_cap * 3 // 4, 100 << 20))
    return tm, vmem_limit


def spectral_mix(x_packed, w_packed):
    """x_packed: [M, Bp, 2Cip], w_packed: [M, 2Cip, 2Cop] (same dtype)
    -> out_packed [M, Bp, 2Cop] = [real | imag] of the per-mode complex
    contraction (padded rows/columns are exactly zero)."""
    M, Bp, Ci2p = x_packed.shape
    Mw, Ci2w, Co2p = w_packed.shape
    assert Mw == M and Ci2w == Ci2p, "x/w packed shapes disagree"

    in_itemsize = jnp.dtype(x_packed.dtype).itemsize
    # bf16 path: store output in bf16 (halves output HBM bytes); f32 path stays exact.
    out_dtype = x_packed.dtype if in_itemsize <= 2 else jnp.float32
    out_itemsize = jnp.dtype(out_dtype).itemsize

    tm, vmem_limit = _choose_mode_tile(M, Bp, Ci2p, Co2p, in_itemsize, out_itemsize)
    grid = (pl.cdiv(M, tm),)

    flops = 2 * M * Bp * Ci2p * Co2p
    bytes_accessed = (in_itemsize * (M * Bp * Ci2p + M * Ci2p * Co2p)
                      + out_itemsize * M * Bp * Co2p)

    # Trailing two dims of every block equal the full (padded) array extents,
    # and the padded extents are (8/16, 128)-dense -> unmasked vld/vst.
    x_spec = pl.BlockSpec((tm, Bp, Ci2p), lambda m: (m, 0, 0))
    w_spec = pl.BlockSpec((tm, Ci2p, Co2p), lambda m: (m, 0, 0))
    o_spec = pl.BlockSpec((tm, Bp, Co2p), lambda m: (m, 0, 0))

    return pl.pallas_call(
        _spectral_mix_kernel,
        out_shape=jax.ShapeDtypeStruct((M, Bp, Co2p), out_dtype),
        grid_spec=pltpu.PrefetchScalarGridSpec(
            num_scalar_prefetch=0,
            grid=grid,
            in_specs=[x_spec, w_spec],
            out_specs=o_spec,
        ),
        compiler_params=pltpu.CompilerParams(
            dimension_semantics=("parallel",),
            vmem_limit_bytes=vmem_limit,
        ),
        cost_estimate=pl.CostEstimate(
            flops=flops, transcendentals=0, bytes_accessed=bytes_accessed),
    )(x_packed, w_packed)


@functools.partial(jax.jit, static_argnames=("out_channels",))
def _spectral_conv1d_forward(x, w_packed, *, out_channels):
    """x: [B, Ci, N] f32, w_packed: [M, 2Cip, 2Cop] (compute dtype, padded)
    -> [B, out_channels, N] f32."""
    B, Ci, N = x.shape
    M, Ci2p, Co2p = w_packed.shape
    Cip, Cop = Ci2p // 2, Co2p // 2
    assert Ci <= Cip, "input channels exceed packed weight channels"
    n_freq = N // 2 + 1

    compute_dtype = w_packed.dtype
    sublane = 16 if jnp.dtype(compute_dtype).itemsize <= 2 else 8
    Bp = _round_up(B, sublane)

    x_ft = jnp.fft.rfft(x)[:, :, :M]                          # [B, Ci, M] complex64

    # mode-major, padded, packed real/imag activations: [M, Bp, 2Cip]
    xr = jnp.transpose(jnp.real(x_ft), (2, 0, 1))             # [M, B, Ci]
    xi = jnp.transpose(jnp.imag(x_ft), (2, 0, 1))
    pad = ((0, 0), (0, Bp - B), (0, Cip - Ci))
    xr = jnp.pad(xr, pad)
    xi = jnp.pad(xi, pad)
    x_packed = jnp.concatenate([xr, xi], axis=-1).astype(compute_dtype)

    out_packed = spectral_mix(x_packed, w_packed)             # [M, Bp, 2Cop]

    out_r = out_packed[:, :B, :out_channels].astype(jnp.float32)
    out_i = out_packed[:, :B, Cop:Cop + out_channels].astype(jnp.float32)
    out_ft_m = jnp.transpose(out_r + 1j * out_i, (1, 2, 0)).astype(jnp.complex64)

    out_ft = jnp.zeros((B, out_channels, n_freq), dtype=jnp.complex64)
    out_ft = out_ft.at[:, :, :M].set(out_ft_m)
    return jnp.fft.irfft(out_ft, n=N).astype(jnp.float32)


class SpectralConv1d:
    """JAX/Pallas port of the PyTorch FNO SpectralConv1d module."""

    def __init__(self, in_channels: int, out_channels: int, modes: int, key,
                 compute_dtype=jnp.bfloat16):
        self.in_channels = in_channels
        self.out_channels = out_channels
        self.modes = modes
        self.scale = 1.0 / (in_channels * out_channels)
        self.compute_dtype = compute_dtype

        k_r, k_i = jax.random.split(key)
        # torch.rand(..., dtype=cfloat): real & imag ~ U[0,1)
        wr = self.scale * jax.random.uniform(
            k_r, (in_channels, out_channels, modes), dtype=jnp.float32)
        wi = self.scale * jax.random.uniform(
            k_i, (in_channels, out_channels, modes), dtype=jnp.float32)
        self.weights = wr + 1j * wi            # [Ci, Co, M] complex64 (reference)

        # Lane-dense padded channel counts: 2*Cip and 2*Cop are multiples of 128.
        cip = _round_up(max(in_channels, 1), 64)
        cop = _round_up(max(out_channels, 1), 64)

        # Packed, mode-major, padded real weight, built ONCE:
        #   W = [[wr, wi], [-wi, wr]]  -> [M, 2*Cip, 2*Cop]
        wr_m = jnp.transpose(wr, (2, 0, 1))                    # [M, Ci, Co]
        wi_m = jnp.transpose(wi, (2, 0, 1))
        padw = ((0, 0), (0, cip - in_channels), (0, cop - out_channels))
        wr_m = jnp.pad(wr_m, padw)
        wi_m = jnp.pad(wi_m, padw)
        top = jnp.concatenate([wr_m, wi_m], axis=-1)           # [M, Cip, 2Cop]
        bot = jnp.concatenate([-wi_m, wr_m], axis=-1)          # [M, Cip, 2Cop]
        w_packed_f32 = jnp.concatenate([top, bot], axis=-2)    # [M, 2Cip, 2Cop]

        # Cast/cache per compute dtype so the forward never re-reads f32 weights.
        self._w_packed_cache = {jnp.dtype(jnp.float32).name: w_packed_f32}
        if jnp.dtype(compute_dtype) != jnp.dtype(jnp.float32):
            self._w_packed_cache[jnp.dtype(compute_dtype).name] = (
                w_packed_f32.astype(compute_dtype))

    def _packed_weight(self, dtype):
        name = jnp.dtype(dtype).name
        if name not in self._w_packed_cache:
            self._w_packed_cache[name] = (
                self._w_packed_cache[jnp.dtype(jnp.float32).name].astype(dtype))
        return self._w_packed_cache[name]

    def __call__(self, x, compute_dtype=None):
        """x: [batch, in_channels, N] f32 -> [batch, out_channels, N] f32."""
        dtype = self.compute_dtype if compute_dtype is None else compute_dtype
        B, Ci, N = x.shape
        if Ci != self.in_channels:
            raise ValueError(f"expected {self.in_channels} input channels, got {Ci}")
        if self.modes > N // 2 + 1:
            raise ValueError(
                f"modes={self.modes} exceeds N//2+1={N // 2 + 1} for N={N}")
        w = self._packed_weight(dtype)
        return _spectral_conv1d_forward(x, w, out_channels=self.out_channels)


if __name__ == "__main__":
    key = jax.random.PRNGKey(0)
    k_w, k_x = jax.random.split(key)

    batch, in_channels, out_channels, N = 2, 4, 4, 16
    modes = 8  # must be <= N // 2 + 1

    layer = SpectralConv1d(in_channels, out_channels, modes, k_w)
    x = jax.random.normal(k_x, (batch, in_channels, N), dtype=jnp.float32)

    y = layer(x)                                   # default bf16 MXU path
    y_f32 = layer(x, compute_dtype=jnp.float32)    # exact-precision path
    jax.block_until_ready((y, y_f32))

    # reference: pure-JAX complex einsum path (mirrors the PyTorch module)
    x_ft = jnp.fft.rfft(x)[:, :, :modes]
    ref_ft = jnp.einsum('bix,iox->box', x_ft, layer.weights)
    out_ft_ref = jnp.zeros((batch, out_channels, N // 2 + 1), dtype=jnp.complex64)
    out_ft_ref = out_ft_ref.at[:, :, :modes].set(ref_ft)
    y_ref = jnp.fft.irfft(out_ft_ref, n=N)

    assert jnp.allclose(y_f32, y_ref, atol=1e-5, rtol=1e-5), "f32 path mismatch vs reference"
    # bf16 matmul inputs/outputs with f32 accumulation: looser tolerance
    assert jnp.allclose(y, y_ref, atol=5e-2, rtol=5e-2), "bf16 path mismatch vs reference"

    print("KERNEL_OK")
</pallas_src>

<mosaic_0001>
module attributes {stable_mosaic.version = 11 : i64} {
  func.func @_spectral_mix_kernel(%arg0: i32, %arg1: memref<8x16x128xbf16, #tpu.memory_space<vmem>>, %arg2: memref<8x128x128xbf16, #tpu.memory_space<vmem>>, %arg3: memref<8x16x128xbf16, #tpu.memory_space<vmem>>) attributes {dimension_semantics = [#tpu.dimension_semantics<parallel>], iteration_bounds = array<i64: 1>, scalar_prefetch = 0 : i64, scratch_operands = 0 : i64, tpu.core_type = #tpu.core_type<tc>, window_params = [{transform_indices = @transform_0, window_bounds = array<i64: 8, 16, 128>}, {transform_indices = @transform_1, window_bounds = array<i64: 8, 128, 128>}, {transform_indices = @transform_2, window_bounds = array<i64: 8, 16, 128>}]} {
    %c0 = arith.constant 0 : index
    %c0_0 = arith.constant 0 : index
    %c0_1 = arith.constant 0 : index
    %0 = vector.load %arg1[%c0, %c0_0, %c0_1] : memref<8x16x128xbf16, #tpu.memory_space<vmem>>, vector<8x16x128xbf16>
    %c0_2 = arith.constant 0 : index
    %c0_3 = arith.constant 0 : index
    %c0_4 = arith.constant 0 : index
    %1 = vector.load %arg2[%c0_2, %c0_3, %c0_4] : memref<8x128x128xbf16, #tpu.memory_space<vmem>>, vector<8x128x128xbf16>
    "tpu.trace_start"() <{level = 10 : i32, message = "mbi,mio->mbo"}> : () -> ()
    %cst = arith.constant dense<0.000000e+00> : vector<8x16x128xf32>
    %2 = tpu.matmul %0, %1, %cst {dimension_numbers = #tpu.dot_dimension_numbers<[2], [1], [1], [2], [0, 0, 0, 1, 1, 2], [0], [0]>} : vector<8x16x128xbf16>, vector<8x128x128xbf16>, vector<8x16x128xf32> -> vector<8x16x128xf32>
    "tpu.trace_stop"() : () -> ()
    %3 = arith.truncf %2 : vector<8x16x128xf32> to vector<8x16x128xbf16>
    %c0_5 = arith.constant 0 : index
    %c0_6 = arith.constant 0 : index
    %c0_7 = arith.constant 0 : index
    %4 = vector.load %arg3[%c0_5, %c0_6, %c0_7] : memref<8x16x128xbf16, #tpu.memory_space<vmem>>, vector<8x16x128xbf16>
    tpu.vector_store %arg3[%c0_5, %c0_6, %c0_7], %3 {strides = array<i32>} : memref<8x16x128xbf16, #tpu.memory_space<vmem>>, vector<8x16x128xbf16>,
    return
  }
  func.func @transform_0(%arg0: i32) -> (i32, i32, i32) {
    %c0_i32 = arith.constant 0 : i32
    %c0_i32_0 = arith.constant 0 : i32
    %c0_i32_1 = arith.constant 0 : i32
    return %arg0, %c0_i32, %c0_i32_0 : i32, i32, i32
  }
  func.func @transform_1(%arg0: i32) -> (i32, i32, i32) {
    %c0_i32 = arith.constant 0 : i32
    %c0_i32_0 = arith.constant 0 : i32
    %c0_i32_1 = arith.constant 0 : i32
    return %arg0, %c0_i32, %c0_i32_0 : i32, i32, i32
  }
  func.func @transform_2(%arg0: i32) -> (i32, i32, i32) {
    %c0_i32 = arith.constant 0 : i32
    %c0_i32_0 = arith.constant 0 : i32
    %c0_i32_1 = arith.constant 0 : i32
    return %arg0, %c0_i32, %c0_i32_0 : i32, i32, i32
  }
}

</mosaic_0001>

<bundles_post_ra>
// kernel: reverse.1
= control target key start
LH: loop header
LB: loop body
LE: loop exit
PB: predicated region body
PF: predicated region fallthrough
CT: control target
= control target key end

     0   :  { %s92_s0 = inlined_call_operand.vmem [shape: f32[2,4,7], index: 0, kind: input, shape index: {}]   ;;  %s93_s1 = inlined_call_operand.vmem [shape: f32[2,4,7], index: 1, kind: output, shape index: {}]  }
   0x1   :  { %v28_v0 = vld [vmem:[%s92_s0 + $0xc] sm:$0x3]  ;;  %v29_v1 = vld [vmem:[%s92_s0 + $0xa] sm:$0x3]  ;;  %v31_v2 = vld [vmem:[%s92_s0 + $0x8] sm:$0x3] }
   0x2   :  { %4 = vst [vmem:[%s93_s1] sm:$0x3] %v28_v0  ;;  %30 = vst [vmem:[%s93_s1 + $0x2] sm:$0x3] %v29_v1  ;;  %v33_v3 = vld [vmem:[%s92_s0 + $0x6] sm:$0x3] }
   0x3   :  { %32 = vst [vmem:[%s93_s1 + $0x4] sm:$0x3] %v31_v2  ;;  %v35_v4 = vld [vmem:[%s92_s0 + $0x4] sm:$0x3]  ;;  %v37_v5 = vld [vmem:[%s92_s0 + $0x2] sm:$0x3] }
   0x4   :  { %34 = vst [vmem:[%s93_s1 + $0x6] sm:$0x3] %v33_v3  ;;  %36 = vst [vmem:[%s93_s1 + $0x8] sm:$0x3] %v35_v4  ;;  %v25_v6 = vld [vmem:[%s92_s0] sm:$0x3] }
   0x5   :  { %38 = vst [vmem:[%s93_s1 + $0xa] sm:$0x3] %v37_v5  ;;  %39 = vst [vmem:[%s93_s1 + $0xc] sm:$0x3] %v25_v6 }

// kernel: _spectral_conv1d_forward.1
= control target key start
LH: loop header
LB: loop body
LE: loop exit
PB: predicated region body
PF: predicated region fallthrough
CT: control target
= control target key end

     0   :  { %7 = vsyncpa [#allocation3], 0  ;;  %s1499_s9 = smov [#allocation2]   ;;  %s1659_s0 = inlined_call_operand.vmem [shape: bf16[8,16,128], index: 0, kind: input, shape index: {}]   ;;  %s1660_s1 = inlined_call_operand.hbm [shape: bf16[8,128,128], index: 1, kind: input, shape index: {}]   ;;  %s1661_s2 = inlined_call_operand.vmem [shape: bf16[8,16,128], index: 2, kind: output, shape index: {}]  }
   0x1   :  { %s15_s10 = sshll.u32 %s1499_s9, 4  ;;  %s1475_s13 = scalar_lea.hbm %s1660_s1, 8192  ;;  %s16_s10 = int_to_ptr.vmem [resolvable:$true] %s15_s10 }
   0x2   :  { %p1476_p0 = scmp.ne.s32.totalorder %s1660_s1, %s1475_s13  ;;  %p1479_p1 = scmp.lt.u32.totalorder %s1475_s13, %s1660_s1 }
   0x4   :  { %p1481_p2 = pnand %p1479_p1, %p1476_p0 }
   0x6   :  { %1484 = shalt.err (!%p1481_p2)
}
   0x7   :  { %s1485_s18 = scalar_lea.vmem %s16_s10, 8192  ;;  %p1490_p4 = scmp.lt.s32.totalorder %s16_s10, %s16_s10 }
   0x8   :  { %p1486_p3 = scmp.ne.s32.totalorder %s16_s10, %s1485_s18  ;;  %p1491_p5 = scmp.lt.s32.totalorder %s1485_s18, %s1485_s18 }
   0xa   :  { %p1492_p6 = por %p1491_p5, %p1490_p4 }
   0xc   :  { %p1493_p7 = pnand %p1492_p6, %p1486_p3 }
   0xe   :  { %1496 = shalt.err (!%p1493_p7)
}
   0xf   :  { %s1500_s19 = smov 64   ;;  %s1501_s20 = smov 4  }
  0x10   :  { %21 = dma.hbm_to_vmem [thread:$0]  %s1660_s1, 8192, %s16_s10, [#allocation3], %s1500_s19, %s1500_s19, %s1501_s20  }
  0x11   :  { %1497 = dma.done.wait [#allocation3], 8192  }
  0x12   :  { %1498 = vsyncadd [#allocation3], 4294959104  ;;  %v1502_v0 = vmov 0.0   ;;  %vm1503_vm0 = vmmov 0   ;;  %v1403_v1 = vld [vmem:[#allocation2] sm:$0xff]   ;;  %v1405_v3 = vld [vmem:[#allocation2 + $0x8] sm:$0xff]  }
  0x13   :  { %1238 = vmatprep.subr.bf16.mxu0 %v1502_v0  ;;  %1258 = vmatprep.subr.bf16.mxu1 %v1502_v0  ;;  %v1404_v2 = vld [vmem:[#allocation2 + $0x40] sm:$0xff]   ;;  %v1406_v4 = vld [vmem:[#allocation2 + $0x48] sm:$0xff]   ;;  %v1407_v5 = vld [vmem:[#allocation2 + $0x10] sm:$0xff]  }
  0x14   :  { %1254 = vmatprep.mubr.msk.bf16.mxu0 %vm1503_vm0, %v1502_v0  ;;  %1274 = vmatprep.mubr.msk.bf16.mxu1 %vm1503_vm0, %v1502_v0  ;;  %v1408_v6 = vld [vmem:[#allocation2 + $0x50] sm:$0xff]   ;;  %v1409_v7 = vld [vmem:[#allocation2 + $0x18] sm:$0xff]   ;;  %v1411_v9 = vld [vmem:[#allocation2 + $0x20] sm:$0xff]  }
  0x15   :  { %1239 = vmatpush3.bf16.msra.mxu0 %v1403_v1  ;;  %1259 = vmatpush3.bf16.msra.mxu1 %v1404_v2  ;;  %v1410_v8 = vld [vmem:[#allocation2 + $0x58] sm:$0xff]   ;;  %v1412_v10 = vld [vmem:[#allocation2 + $0x60] sm:$0xff]   ;;  %v1413_v11 = vld [vmem:[#allocation2 + $0x28] sm:$0xff]  }
  0x16   :  { %1240 = vmatprep.subr.bf16.mxu0 %v1502_v0  ;;  %1260 = vmatprep.subr.bf16.mxu1 %v1502_v0  ;;  %v1414_v12 = vld [vmem:[#allocation2 + $0x68] sm:$0xff]   ;;  %v1415_v13 = vld [vmem:[#allocation2 + $0x30] sm:$0xff]   ;;  %v1417_v15 = vld [vmem:[#allocation2 + $0x38] sm:$0xff]  }
  0x17   :  { %v1416_v14 = vld [vmem:[#allocation2 + $0x70] sm:$0xff]   ;;  %v1418_v16 = vld [vmem:[#allocation2 + $0x78] sm:$0xff]   ;;  %v1419_v17 = vld [vmem:[%s1659_s0] sm:$0xff]  }
  0x18   :  { %v1420_v18 = vld [vmem:[%s1659_s0 + $0x8] sm:$0xff]   ;;  %v1421_v19 = vld [vmem:[#allocation2 + $0x80] sm:$0xff]   ;;  %v1425_v23 = vld [vmem:[#allocation2 + $0x90] sm:$0xff]  }
  0x19   :  { %1241 = vmatpush3.bf16.msra.mxu0 %v1405_v3  ;;  %1261 = vmatpush3.bf16.msra.mxu1 %v1406_v4  ;;  %v1422_v20 = vld [vmem:[#allocation2 + $0xc0] sm:$0xff]   ;;  %v1423_v21 = vld [vmem:[#allocation2 + $0x88] sm:$0xff]   ;;  %v1426_v24 = vld [vmem:[#allocation2 + $0xd0] sm:$0xff]  }
  0x1a   :  { %1242 = vmatprep.subr.bf16.mxu0 %v1502_v0  ;;  %1262 = vmatprep.subr.bf16.mxu1 %v1502_v0  ;;  %v1424_v22 = vld [vmem:[#allocation2 + $0xc8] sm:$0xff]   ;;  %v1427_v25 = vld [vmem:[#allocation2 + $0x98] sm:$0xff]   ;;  %v1429_v27 = vld [vmem:[#allocation2 + $0xa0] sm:$0xff]  }
  0x1b   :  { %v1428_v26 = vld [vmem:[#allocation2 + $0xd8] sm:$0xff]   ;;  %v1430_v28 = vld [vmem:[#allocation2 + $0xe0] sm:$0xff]   ;;  %v1431_v29 = vld [vmem:[#allocation2 + $0xa8] sm:$0xff]  }
  0x1c   :  { %v1432_v30 = vld [vmem:[#allocation2 + $0xe8] sm:$0xff]   ;;  %v1433_v31 = vld [vmem:[#allocation2 + $0xb0] sm:$0xff]   ;;  %v1435_v33 = vld [vmem:[#allocation2 + $0xb8] sm:$0xff]  }
  0x1d   :  { %1243 = vmatpush3.bf16.msra.mxu0 %v1407_v5  ;;  %1263 = vmatpush3.bf16.msra.mxu1 %v1408_v6  ;;  %v1434_v32 = vld [vmem:[#allocation2 + $0xf0] sm:$0xff]   ;;  %v1436_v34 = vld [vmem:[#allocation2 + $0xf8] sm:$0xff]   ;;  %v1439_v37 = vld [vmem:[#allocation2 + $0x100] sm:$0xff]  }
  0x1e   :  { %1244 = vmatprep.subr.bf16.mxu0 %v1502_v0  ;;  %1264 = vmatprep.subr.bf16.mxu1 %v1502_v0  ;;  %v1437_v35 = vld [vmem:[%s1659_s0 + $0x10] sm:$0xff]   ;;  %v1438_v36 = vld [vmem:[%s1659_s0 + $0x18] sm:$0xff]   ;;  %v1440_v38 = vld [vmem:[#allocation2 + $0x140] sm:$0xff]  }
  0x1f   :  { %v1441_v39 = vld [vmem:[#allocation2 + $0x108] sm:$0xff]   ;;  %v1443_v41 = vld [vmem:[#allocation2 + $0x110] sm:$0xff]   ;;  %v1445_v43 = vld [vmem:[#allocation2 + $0x118] sm:$0xff]  }
  0x20   :  { %v1442_v40 = vld [vmem:[#allocation2 + $0x148] sm:$0xff]   ;;  %v1444_v42 = vld [vmem:[#allocation2 + $0x150] sm:$0xff]   ;;  %v1446_v44 = vld [vmem:[#allocation2 + $0x158] sm:$0xff]  }
  0x21   :  { %1245 = vmatpush3.bf16.msra.mxu0 %v1409_v7  ;;  %1265 = vmatpush3.bf16.msra.mxu1 %v1410_v8  ;;  %v1447_v45 = vld [vmem:[#allocation2 + $0x120] sm:$0xff]   ;;  %v1449_v47 = vld [vmem:[#allocation2 + $0x128] sm:$0xff]   ;;  %v1451_v49 = vld [vmem:[#allocation2 + $0x130] sm:$0xff]  }
  0x22   :  { %1246 = vmatprep.subr.bf16.mxu0 %v1502_v0  ;;  %1266 = vmatprep.subr.bf16.mxu1 %v1502_v0  ;;  %v1448_v46 = vld [vmem:[#allocation2 + $0x160] sm:$0xff]   ;;  %v1450_v48 = vld [vmem:[#allocation2 + $0x168] sm:$0xff]   ;;  %v1452_v50 = vld [vmem:[#allocation2 + $0x170] sm:$0xff]  }
  0x23   :  { %v1453_v51 = vld [vmem:[#allocation2 + $0x138] sm:$0xff]   ;;  %v1455_v53 = vld [vmem:[%s1659_s0 + $0x20] sm:$0xff]   ;;  %v1456_v54 = vld [vmem:[%s1659_s0 + $0x28] sm:$0xff]  }
  0x24   :  { %v1454_v52 = vld [vmem:[#allocation2 + $0x178] sm:$0xff]   ;;  %v1457_v55 = vld [vmem:[#allocation2 + $0x180] sm:$0xff]   ;;  %v1459_v57 = vld [vmem:[#allocation2 + $0x188] sm:$0xff]  }
  0x25   :  { %1247 = vmatpush3.bf16.msra.mxu0 %v1411_v9  ;;  %1267 = vmatpush3.bf16.msra.mxu1 %v1412_v10  ;;  %v1458_v56 = vld [vmem:[#allocation2 + $0x1c0] sm:$0xff]   ;;  %v1460_v58 = vld [vmem:[#allocation2 + $0x1c8] sm:$0xff]   ;;  %v1461_v59 = vld [vmem:[#allocation2 + $0x190] sm:$0xff]  }
  0x26   :  { %1248 = vmatprep.subr.bf16.mxu0 %v1502_v0  ;;  %1268 = vmatprep.subr.bf16.mxu1 %v1502_v0  ;;  %v1462_v60 = vld [vmem:[#allocation2 + $0x1d0] sm:$0xff]   ;;  %v1463_v61 = vld [vmem:[#allocation2 + $0x198] sm:$0xff]   ;;  %v1465_v63 = vld [vmem:[#allocation2 + $0x1a0] sm:$0xff]  }
  0x27   :  { %v1464_v62 = vld [vmem:[#allocation2 + $0x1d8] sm:$0xff]   ;;  %v1466_v1 = vld [vmem:[#allocation2 + $0x1e0] sm:$0xff]   ;;  %v1467_v2 = vld [vmem:[#allocation2 + $0x1a8] sm:$0xff]  }
  0x28   :  { %v1468_v3 = vld [vmem:[#allocation2 + $0x1e8] sm:$0xff]   ;;  %v1469_v4 = vld [vmem:[#allocation2 + $0x1b0] sm:$0xff]   ;;  %v1471_v6 = vld [vmem:[#allocation2 + $0x1b8] sm:$0xff]  }
  0x29   :  { %1249 = vmatpush3.bf16.msra.mxu0 %v1413_v11  ;;  %1269 = vmatpush3.bf16.msra.mxu1 %v1414_v12  ;;  %v1470_v5 = vld [vmem:[#allocation2 + $0x1f0] sm:$0xff]   ;;  %v1472_v7 = vld [vmem:[#allocation2 + $0x1f8] sm:$0xff]  }
  0x2a   :  { %1250 = vmatprep.subr.bf16.mxu0 %v1502_v0  ;;  %1270 = vmatprep.subr.bf16.mxu1 %v1502_v0  ;;  %v1473_v8 = vld [vmem:[%s1659_s0 + $0x30] sm:$0xff]   ;;  %v1474_v9 = vld [vmem:[%s1659_s0 + $0x38] sm:$0xff]  }
  0x2d   :  { %1251 = vmatpush3.bf16.msra.mxu0 %v1415_v13  ;;  %1271 = vmatpush3.bf16.msra.mxu1 %v1416_v14 }
  0x2e   :  { %1252 = vmatprep.subr.bf16.mxu0 %v1502_v0  ;;  %1272 = vmatprep.subr.bf16.mxu1 %v1502_v0 }
  0x31   :  { %1253 = vmatpush3.bf16.msra.mxu0 %v1417_v15  ;;  %1273 = vmatpush3.bf16.msra.mxu1 %v1418_v16 }
  0x32   :  { %1278 = vmatprep.subr.bf16.mxu0 %v1502_v0  ;;  %1298 = vmatprep.subr.bf16.mxu1 %v1502_v0 }
  0x34   :  { %1255 = vmatmul.mubr.bf16.vlgmr.msra.gmra.mrb[0].mxu0 %v1419_v17  ;;  %1275 = vmatmul.mubr.bf16.vlgmr.msra.gmra.mrb[0].mxu1 %v1420_v18 }
  0x35   :  { %1279 = vmatpush3.bf16.msra.mxu0 %v1421_v19  ;;  %1299 = vmatpush3.bf16.msra.mxu1 %v1422_v20 }
  0x36   :  { %1280 = vmatprep.subr.bf16.mxu0 %v1502_v0  ;;  %1300 = vmatprep.subr.bf16.mxu1 %v1502_v0 }
  0x37   :  { %1294 = vmatprep.mubr.msk.bf16.mxu0 %vm1503_vm0, %v1502_v0  ;;  %1314 = vmatprep.mubr.msk.bf16.mxu1 %vm1503_vm0, %v1502_v0 }
  0x39   :  { %1281 = vmatpush3.bf16.msra.mxu0 %v1423_v21  ;;  %1301 = vmatpush3.bf16.msra.mxu1 %v1424_v22 }
  0x3a   :  { %1282 = vmatprep.subr.bf16.mxu0 %v1502_v0  ;;  %1302 = vmatprep.subr.bf16.mxu1 %v1502_v0 }
  0x3d   :  { %1283 = vmatpush3.bf16.msra.mxu0 %v1425_v23  ;;  %1303 = vmatpush3.bf16.msra.mxu1 %v1426_v24 }
  0x3e   :  { %1284 = vmatprep.subr.bf16.mxu0 %v1502_v0  ;;  %1304 = vmatprep.subr.bf16.mxu1 %v1502_v0 }
  0x41   :  { %1285 = vmatpush3.bf16.msra.mxu0 %v1427_v25  ;;  %1305 = vmatpush3.bf16.msra.mxu1 %v1428_v26 }
  0x42   :  { %1286 = vmatprep.subr.bf16.mxu0 %v1502_v0  ;;  %1306 = vmatprep.subr.bf16.mxu1 %v1502_v0 }
  0x45   :  { %1287 = vmatpush3.bf16.msra.mxu0 %v1429_v27  ;;  %1307 = vmatpush3.bf16.msra.mxu1 %v1430_v28 }
  0x46   :  { %1288 = vmatprep.subr.bf16.mxu0 %v1502_v0  ;;  %1308 = vmatprep.subr.bf16.mxu1 %v1502_v0 }
  0x49   :  { %1289 = vmatpush3.bf16.msra.mxu0 %v1431_v29  ;;  %1309 = vmatpush3.bf16.msra.mxu1 %v1432_v30 }
  0x4a   :  { %1290 = vmatprep.subr.bf16.mxu0 %v1502_v0  ;;  %1310 = vmatprep.subr.bf16.mxu1 %v1502_v0 }
  0x4d   :  { %1291 = vmatpush3.bf16.msra.mxu0 %v1433_v31  ;;  %1311 = vmatpush3.bf16.msra.mxu1 %v1434_v32 }
  0x4e   :  { %1292 = vmatprep.subr.bf16.mxu0 %v1502_v0  ;;  %1312 = vmatprep.subr.bf16.mxu1 %v1502_v0 }
  0x51   :  { %1293 = vmatpush3.bf16.msra.mxu0 %v1435_v33  ;;  %1313 = vmatpush3.bf16.msra.mxu1 %v1436_v34 }
  0x52   :  { %1318 = vmatprep.subr.bf16.mxu0 %v1502_v0  ;;  %1338 = vmatprep.subr.bf16.mxu1 %v1502_v0 }
  0x54   :  { %1295 = vmatmul.mubr.bf16.vlgmr.msra.gmra.mrb[4].mxu0 %v1437_v35  ;;  %1315 = vmatmul.mubr.bf16.vlgmr.msra.gmra.mrb[4].mxu1 %v1438_v36 }
  0x55   :  { %1319 = vmatpush3.bf16.msra.mxu0 %v1439_v37  ;;  %1339 = vmatpush3.bf16.msra.mxu1 %v1440_v38 }
  0x56   :  { %1320 = vmatprep.subr.bf16.mxu0 %v1502_v0  ;;  %1340 = vmatprep.subr.bf16.mxu1 %v1502_v0 }
  0x57   :  { %1334 = vmatprep.mubr.msk.bf16.mxu0 %vm1503_vm0, %v1502_v0  ;;  %1354 = vmatprep.mubr.msk.bf16.mxu1 %vm1503_vm0, %v1502_v0 }
  0x59   :  { %1321 = vmatpush3.bf16.msra.mxu0 %v1441_v39  ;;  %1341 = vmatpush3.bf16.msra.mxu1 %v1442_v40 }
  0x5a   :  { %1322 = vmatprep.subr.bf16.mxu0 %v1502_v0  ;;  %1342 = vmatprep.subr.bf16.mxu1 %v1502_v0 }
  0x5d   :  { %1323 = vmatpush3.bf16.msra.mxu0 %v1443_v41  ;;  %1343 = vmatpush3.bf16.msra.mxu1 %v1444_v42 }
  0x5e   :  { %1324 = vmatprep.subr.bf16.mxu0 %v1502_v0  ;;  %1344 = vmatprep.subr.bf16.mxu1 %v1502_v0 }
  0x61   :  { %1325 = vmatpush3.bf16.msra.mxu0 %v1445_v43  ;;  %1345 = vmatpush3.bf16.msra.mxu1 %v1446_v44 }
  0x62   :  { %1326 = vmatprep.subr.bf16.mxu0 %v1502_v0  ;;  %1346 = vmatprep.subr.bf16.mxu1 %v1502_v0 }
  0x65   :  { %1327 = vmatpush3.bf16.msra.mxu0 %v1447_v45  ;;  %1347 = vmatpush3.bf16.msra.mxu1 %v1448_v46 }
  0x66   :  { %1328 = vmatprep.subr.bf16.mxu0 %v1502_v0  ;;  %1348 = vmatprep.subr.bf16.mxu1 %v1502_v0 }
  0x69   :  { %1329 = vmatpush3.bf16.msra.mxu0 %v1449_v47  ;;  %1349 = vmatpush3.bf16.msra.mxu1 %v1450_v48 }
  0x6a   :  { %1330 = vmatprep.subr.bf16.mxu0 %v1502_v0  ;;  %1350 = vmatprep.subr.bf16.mxu1 %v1502_v0 }
  0x6d   :  { %1331 = vmatpush3.bf16.msra.mxu0 %v1451_v49  ;;  %1351 = vmatpush3.bf16.msra.mxu1 %v1452_v50 }
  0x6e   :  { %1332 = vmatprep.subr.bf16.mxu0 %v1502_v0  ;;  %1352 = vmatprep.subr.bf16.mxu1 %v1502_v0 }
  0x71   :  { %1333 = vmatpush3.bf16.msra.mxu0 %v1453_v51  ;;  %1353 = vmatpush3.bf16.msra.mxu1 %v1454_v52 }
  0x72   :  { %1358 = vmatprep.subr.bf16.mxu0 %v1502_v0  ;;  %1378 = vmatprep.subr.bf16.mxu1 %v1502_v0 }
  0x74   :  { %1335 = vmatmul.mubr.bf16.vlgmr.msra.gmra.mrb[8].mxu0 %v1455_v53  ;;  %1355 = vmatmul.mubr.bf16.vlgmr.msra.gmra.mrb[8].mxu1 %v1456_v54 }
  0x75   :  { %1359 = vmatpush3.bf16.msra.mxu0 %v1457_v55  ;;  %1379 = vmatpush3.bf16.msra.mxu1 %v1458_v56 }
  0x76   :  { %1360 = vmatprep.subr.bf16.mxu0 %v1502_v0  ;;  %1380 = vmatprep.subr.bf16.mxu1 %v1502_v0 }
  0x77   :  { %1374 = vmatprep.mubr.msk.bf16.mxu0 %vm1503_vm0, %v1502_v0  ;;  %1394 = vmatprep.mubr.msk.bf16.mxu1 %vm1503_vm0, %v1502_v0 }
  0x79   :  { %1361 = vmatpush3.bf16.msra.mxu0 %v1459_v57  ;;  %1381 = vmatpush3.bf16.msra.mxu1 %v1460_v58 }
  0x7a   :  { %1362 = vmatprep.subr.bf16.mxu0 %v1502_v0  ;;  %1382 = vmatprep.subr.bf16.mxu1 %v1502_v0 }
  0x7d   :  { %1363 = vmatpush3.bf16.msra.mxu0 %v1461_v59  ;;  %1383 = vmatpush3.bf16.msra.mxu1 %v1462_v60 }
  0x7e   :  { %1364 = vmatprep.subr.bf16.mxu0 %v1502_v0  ;;  %1384 = vmatprep.subr.bf16.mxu1 %v1502_v0 }
  0x81   :  { %1365 = vmatpush3.bf16.msra.mxu0 %v1463_v61  ;;  %1385 = vmatpush3.bf16.msra.mxu1 %v1464_v62 }
  0x82   :  { %1366 = vmatprep.subr.bf16.mxu0 %v1502_v0  ;;  %1386 = vmatprep.subr.bf16.mxu1 %v1502_v0 }
  0x85   :  { %1367 = vmatpush3.bf16.msra.mxu0 %v1465_v63  ;;  %1387 = vmatpush3.bf16.msra.mxu1 %v1466_v1 }
  0x86   :  { %1368 = vmatprep.subr.bf16.mxu0 %v1502_v0  ;;  %1388 = vmatprep.subr.bf16.mxu1 %v1502_v0 }
  0x89   :  { %1369 = vmatpush3.bf16.msra.mxu0 %v1467_v2  ;;  %1389 = vmatpush3.bf16.msra.mxu1 %v1468_v3 }
  0x8a   :  { %1370 = vmatprep.subr.bf16.mxu0 %v1502_v0  ;;  %1390 = vmatprep.subr.bf16.mxu1 %v1502_v0 }
  0x8d   :  { %1371 = vmatpush3.bf16.msra.mxu0 %v1469_v4  ;;  %1391 = vmatpush3.bf16.msra.mxu1 %v1470_v5 }
  0x8e   :  { %1372 = vmatprep.subr.bf16.mxu0 %v1502_v0  ;;  %1392 = vmatprep.subr.bf16.mxu1 %v1502_v0 }
  0x91   :  { %1373 = vmatpush3.bf16.msra.mxu0 %v1471_v6  ;;  %1393 = vmatpush3.bf16.msra.mxu1 %v1472_v7 }
  0x94   :  { %1375 = vmatmul.mubr.bf16.vlgmr.msra.gmra.mrb[12].mxu0 %v1473_v8  ;;  %1395 = vmatmul.mubr.bf16.vlgmr.msra.gmra.mrb[12].mxu1 %v1474_v9 }
 0x107   :  { %v258_v10 = vpop.f32.mrb[0].mxu0  ;;  %v353_v11 = vpop.f32.mrb[0].mxu1 }
 0x108   :  { %v1256_v12 = vpop.f32.mrb[1].mxu0  ;;  %v1276_v13 = vpop.f32.mrb[1].mxu1 }
 0x109   :  { %v261_v14 = vpop.f32.mrb[2].mxu0  ;;  %v356_v16 = vpop.f32.mrb[2].mxu1 }
 0x10a   :  { %v1122_v15 = vpack.c.bf16 %v261_v14, %v258_v10  ;;  %v1257_v0 = vpop.f32.mrb[3].mxu0  ;;  %v1127_v17 = vpack.c.bf16 %v356_v16, %v353_v11  ;;  %v1277_v18 = vpop.f32.mrb[3].mxu1 }
 0x10c   :  { %1123 = vst [vmem:[%s1661_s2] sm:$0xff] %v1122_v15   ;;  %1159 = vst [vmem:[%s1661_s2 + $0x8] sm:$0xff] %v1127_v17  }
 0x127   :  { %v448_v19 = vpop.f32.mrb[4].mxu0  ;;  %v543_v20 = vpop.f32.mrb[4].mxu1 }
 0x128   :  { %v1296_v21 = vpop.f32.mrb[5].mxu0  ;;  %v1316_v22 = vpop.f32.mrb[5].mxu1 }
 0x129   :  { %v451_v23 = vpop.f32.mrb[6].mxu0  ;;  %v546_v25 = vpop.f32.mrb[6].mxu1 }
 0x12a   :  { %v1132_v24 = vpack.c.bf16 %v451_v23, %v448_v19  ;;  %v1297_v26 = vpop.f32.mrb[7].mxu0  ;;  %v1137_v27 = vpack.c.bf16 %v546_v25, %v543_v20  ;;  %v1317_v28 = vpop.f32.mrb[7].mxu1 }
 0x12c   :  { %1160 = vst [vmem:[%s1661_s2 + $0x10] sm:$0xff] %v1132_v24   ;;  %1161 = vst [vmem:[%s1661_s2 + $0x18] sm:$0xff] %v1137_v27  }
 0x147   :  { %v638_v29 = vpop.f32.mrb[8].mxu0  ;;  %v733_v30 = vpop.f32.mrb[8].mxu1 }
 0x148   :  { %v1336_v31 = vpop.f32.mrb[9].mxu0  ;;  %v1356_v32 = vpop.f32.mrb[9].mxu1 }
 0x149   :  { %v641_v33 = vpop.f32.mrb[10].mxu0  ;;  %v736_v35 = vpop.f32.mrb[10].mxu1 }
 0x14a   :  { %v1142_v34 = vpack.c.bf16 %v641_v33, %v638_v29  ;;  %v1337_v36 = vpop.f32.mrb[11].mxu0  ;;  %v1147_v37 = vpack.c.bf16 %v736_v35, %v733_v30  ;;  %v1357_v38 = vpop.f32.mrb[11].mxu1 }
 0x14c   :  { %1162 = vst [vmem:[%s1661_s2 + $0x20] sm:$0xff] %v1142_v34   ;;  %1163 = vst [vmem:[%s1661_s2 + $0x28] sm:$0xff] %v1147_v37  }
 0x167   :  { %v828_v39 = vpop.f32.mrb[12].mxu0  ;;  %v923_v40 = vpop.f32.mrb[12].mxu1 }
 0x168   :  { %v1376_v41 = vpop.f32.mrb[13].mxu0  ;;  %v1396_v42 = vpop.f32.mrb[13].mxu1 }
 0x169   :  { %v831_v43 = vpop.f32.mrb[14].mxu0  ;;  %v926_v45 = vpop.f32.mrb[14].mxu1 }
 0x16a   :  { %v1152_v44 = vpack.c.bf16 %v831_v43, %v828_v39  ;;  %v1377_v46 = vpop.f32.mrb[15].mxu0  ;;  %v1157_v47 = vpack.c.bf16 %v926_v45, %v923_v40  ;;  %v1397_v48 = vpop.f32.mrb[15].mxu1 }
 0x16c   :  { %1164 = vst [vmem:[%s1661_s2 + $0x30] sm:$0xff] %v1152_v44   ;;  %1165 = vst [vmem:[%s1661_s2 + $0x38] sm:$0xff] %v1157_v47  }
 0x16d   :  { %1014 = vsyncpa [#allocation3], 1 }

</bundles_post_ra>
